<compile_context>
chip_gen: v6e
topology: v6e:2x2x1
jax: 0.10.0
libtpu: 0.0.40
codegen_flags: <defaults>
</compile_context>

<pallas_src>
import functools

import jax
import jax.numpy as jnp
from jax.experimental import pallas as pl
from jax.experimental.pallas import tpu as pltpu

GEM_EPS = 1e-6   # clamp epsilon inside GeneralizedMeanPoolingP
BN_EPS = 1e-5    # BatchNorm1d eps
LANE = 128


def _round_up(x, m):
    return ((x + m - 1) // m) * m


def _gem_cls_kernel(p_ref, x_ref, w_ref, b_ref, o_ref, *, spatial_axis):
    # p_ref: SMEM (1,) f32      learnable GeM exponent p
    # x_ref: VMEM [TB, C, HW] or [TB, HW, C]   feature tile (pipelined over batch)
    # w_ref: VMEM [N_pad, C]    classifier weight with BN scale folded in (resident)
    # b_ref: VMEM [1, N_pad]    BN shift projected through the classifier (resident, f32)
    # o_ref: VMEM [TB, N_pad]   f32 logits
    p = p_ref[0]

    x = x_ref[...]
    # Transcendentals/VPU work run in the streaming dtype (bf16 ~2x EUP/VPU on v6e/v7x);
    # the spatial mean is always accumulated in f32.
    cdt = x.dtype if x.dtype == jnp.bfloat16 else jnp.float32
    x = jnp.maximum(x.astype(cdt), jnp.asarray(GEM_EPS, cdt))
    p_c = p.astype(cdt)

    def _pow_cube(v):                       # fast path: p == 3 -> pure VPU work
        return v * v * v

    def _pow_general(v):                    # general path: x**p = exp(p*log(x)), x > 0
        return jnp.exp(p_c * jnp.log(v))

    xp = jax.lax.cond(p == 3.0, _pow_cube, _pow_general, x)

    pooled = jnp.mean(xp.astype(jnp.float32), axis=spatial_axis)   # [TB, C], f32 accumulate
    pooled = jnp.exp(jnp.log(pooled) / p)                          # (.) ** (1/p)

    # Classifier with BN folded in: o = pooled @ w_eff.T + b_eff  (contract C on both)
    cls = jax.lax.dot_general(
        pooled.astype(w_ref.dtype), w_ref[...],
        dimension_numbers=(((1,), (1,)), ((), ())),
        preferred_element_type=jnp.float32)
    o_ref[...] = cls + b_ref[...]


def _choose_tb(B, tb_cap):
    """Pick the batch tile: multiple of 8 (or the full batch), within the VMEM cap,
    preferring >=2 grid steps (dual-TC on v7x) and minimal batch padding."""
    tb_cap = max(8, (min(int(tb_cap), 128) // 8) * 8)
    if B <= 16 and B <= tb_cap:
        # Tiny batch: one full-size block (block dim == array dim satisfies the (8,128)
        # rule); padding up just to split across TCs would cost more than it saves.
        return B
    lo = 32 if (B >= 32 and tb_cap >= 32) else 8      # amortize per-step overhead
    cands = list(range(lo, tb_cap + 1, 8)) or [tb_cap]
    multi = [t for t in cands if -(-B // t) >= 2]     # keep both v7x TCs busy if possible
    pool = multi or cands
    return min(pool, key=lambda t: (-(-B // t) * t, -t))   # min padding, then biggest tile


def aux_classifier_head(x_nchw, p, gamma, beta, running_mean, running_var, w_cls,
                        *, stream_dtype=jnp.bfloat16, weight_dtype=jnp.bfloat16):
    """Forward pass. x_nchw: [B, C, H, W]; w_cls: [num_classes, C].
    Returns [B, num_classes] float32 (inference-mode BatchNorm).
    Use stream_dtype/weight_dtype=jnp.float32 on v5e (no bf16 VPU/EUP) or when
    bit-exactness against an f32 reference is required."""
    B, C, H, W = x_nchw.shape
    HW = H * W
    N = w_cls.shape[0]
    N_pad = max(LANE, _round_up(N, LANE))

    # ---- fold BatchNorm1d (eval) into the classifier (numerically exact) ----
    scale = (gamma / jnp.sqrt(running_var + BN_EPS)).astype(jnp.float32)   # [C]
    shift = (beta - running_mean * scale).astype(jnp.float32)              # [C]
    w_eff = w_cls.astype(jnp.float32) * scale[None, :]                     # [N, C]
    b_eff = w_cls.astype(jnp.float32) @ shift                              # [N]

    w_pad = jnp.pad(w_eff, ((0, N_pad - N), (0, 0))).astype(weight_dtype)  # [N_pad, C]
    b_pad = jnp.pad(b_eff, (0, N_pad - N)).reshape(1, N_pad)               # [1, N_pad] f32

    # ---- pick the x layout with the least vreg padding (lane-dense reduction) ----
    itemsize = jnp.dtype(stream_dtype).itemsize
    sub_gran = 8 * (4 // itemsize)                     # sublane granularity: 8 f32 / 16 bf16
    tile_c_hw = _round_up(C, sub_gran) * _round_up(HW, LANE)   # layout [B, C, HW]
    tile_hw_c = _round_up(HW, sub_gran) * _round_up(C, LANE)   # layout [B, HW, C]
    reduce_lanes = tile_c_hw <= tile_hw_c              # True -> keep [B, C, HW]
    row_bytes = min(tile_c_hw, tile_hw_c) * itemsize   # padded VMEM bytes per batch row

    # ---- generation-aware VMEM budget (v7x: 64 MiB/TC, v5e/v6e: 128 MiB) ----
    try:
        phys_vmem = int(pltpu.get_tpu_info().vmem_capacity_bytes)
    except Exception:
        phys_vmem = 64 << 20                           # conservative (v7x per-TC)
    vmem_cap = max(16 << 20, phys_vmem - (6 << 20))    # leave compiler headroom

    w_itemsize = jnp.dtype(weight_dtype).itemsize
    w_gran = 8 * (4 // w_itemsize)
    w_bytes = _round_up(N_pad, w_gran) * _round_up(C, LANE) * w_itemsize   # resident, 1 copy
    b_bytes = 8 * N_pad * 4
    out_row_bytes = N_pad * 4

    # Per-batch-row VMEM: double-buffered x tile + in-kernel intermediates (cond result /
    # f32 upcast) + double-buffered output tile.
    inter_factor = 1 + (4 // itemsize)
    per_row = (2 + inter_factor) * row_bytes + 2 * out_row_bytes
    dyn_budget = vmem_cap - w_bytes - b_bytes - (2 << 20)
    tb_cap = max(1, dyn_budget // per_row)

    TB = _choose_tb(B, tb_cap)
    B_pad = _round_up(B, TB)

    needed = ((2 + inter_factor) * TB * row_bytes
              + 2 * _round_up(TB, 8) * out_row_bytes
              + w_bytes + b_bytes + (2 << 20))
    vmem_limit = int(min(max(needed, 32 << 20), vmem_cap))

    # ---- prepare x: flatten spatial, pick layout, downcast for the HBM stream ----
    # NOTE: in a full model the backbone should hand over x already as bf16 [B, HW, C]
    # so this cast/transpose pass over HBM disappears entirely.
    x = x_nchw.reshape(B, C, HW)
    if not reduce_lanes:
        x = jnp.transpose(x, (0, 2, 1))                # [B, HW, C]  (C on lanes)
    x = x.astype(stream_dtype)
    if B_pad > B:
        x = jnp.pad(x, ((0, B_pad - B), (0, 0), (0, 0)))

    p_arr = jnp.asarray(p, jnp.float32).reshape(1)
    x_block = (TB,) + x.shape[1:]
    kernel = functools.partial(_gem_cls_kernel,
                               spatial_axis=2 if reduce_lanes else 1)

    out_full = pl.pallas_call(
        kernel,
        out_shape=jax.ShapeDtypeStruct((B_pad, N_pad), jnp.float32),
        grid=(B_pad // TB,),
        in_specs=[
            pl.BlockSpec(memory_space=pltpu.MemorySpace.SMEM),   # p (scalar)
            pl.BlockSpec(x_block, lambda i: (i, 0, 0)),          # x tile (pipelined)
            pl.BlockSpec(memory_space=pltpu.MemorySpace.VMEM),   # W: whole-array resident (1 copy)
            pl.BlockSpec(memory_space=pltpu.MemorySpace.VMEM),   # bias: resident (1 copy)
        ],
        out_specs=pl.BlockSpec((TB, N_pad), lambda i: (i, 0)),   # lane-dense output
        compiler_params=pltpu.CompilerParams(
            dimension_semantics=("parallel",),
            vmem_limit_bytes=vmem_limit),
    )(p_arr, x, w_pad, b_pad)

    return out_full[:B, :N]


def _reference(x_nchw, p, gamma, beta, running_mean, running_var, w_cls):
    x = jnp.maximum(x_nchw.astype(jnp.float32), GEM_EPS)          # clamp(min=eps)
    pooled = jnp.mean(x ** p, axis=(2, 3)) ** (1.0 / p)           # GeM
    bn = (pooled - running_mean) / jnp.sqrt(running_var + BN_EPS) * gamma + beta
    return bn @ w_cls.T


if __name__ == "__main__":
    key = jax.random.PRNGKey(0)

    def make_inputs(k, B, C, H, W, num_classes, p_val):
        k1, k2, k3, k4, k5 = jax.random.split(k, 5)
        x = jax.random.normal(k1, (B, C, H, W), jnp.float32)
        p = jnp.float32(p_val)                                          # GeM exponent
        gamma = 1.0 + 0.1 * jax.random.normal(k2, (C,), jnp.float32)    # BN weight
        beta = jnp.zeros((C,), jnp.float32)                             # BN bias (frozen)
        running_mean = 0.1 * jax.random.normal(k3, (C,), jnp.float32)
        running_var = 1.0 + 0.1 * jax.random.uniform(k4, (C,), jnp.float32)
        w_cls = 0.001 * jax.random.normal(k5, (num_classes, C), jnp.float32)
        return x, p, gamma, beta, running_mean, running_var, w_cls

    k1, k2 = jax.random.split(key)

    # Case 1: f32 end-to-end — bit-accurate path; exercises the p==3 cube fast path
    # and the [B, C, HW] lane-reduce layout.
    args1 = make_inputs(k1, B=2, C=32, H=8, W=8, num_classes=16, p_val=3.0)
    out1 = jax.block_until_ready(
        aux_classifier_head(*args1, stream_dtype=jnp.float32, weight_dtype=jnp.float32))
    ref1 = _reference(*args1)
    assert out1.shape == (2, 16)
    assert jnp.allclose(out1, ref1, atol=1e-4, rtol=1e-4), "f32 path mismatch vs reference"

    # Case 2: default bf16 streaming + bf16 weights — exercises the general exp/log path
    # and the [B, HW, C] sublane-reduce layout (HW=49 not a multiple of 128).
    args2 = make_inputs(k2, B=4, C=128, H=7, W=7, num_classes=24, p_val=2.5)
    out2 = jax.block_until_ready(aux_classifier_head(*args2))
    ref2 = _reference(*args2)
    assert out2.shape == (4, 24)
    max_err = float(jnp.max(jnp.abs(out2 - ref2)))
    assert jnp.allclose(out2, ref2, atol=3e-3, rtol=5e-2), \
        f"bf16 path mismatch vs reference (max abs err {max_err})"

    print("KERNEL_OK")
</pallas_src>

<mosaic_0001>
module attributes {stable_mosaic.version = 11 : i64} {
  func.func @_gem_cls_kernel(%arg0: i32, %arg1: memref<1xf32, #tpu.memory_space<smem>>, %arg2: memref<2x32x64xf32, #tpu.memory_space<vmem>>, %arg3: memref<128x32xf32, #tpu.memory_space<vmem>>, %arg4: memref<1x128xf32, #tpu.memory_space<vmem>>, %arg5: memref<2x128xf32, #tpu.memory_space<vmem>>) attributes {dimension_semantics = [#tpu.dimension_semantics<parallel>], iteration_bounds = array<i64: 1>, scalar_prefetch = 0 : i64, scratch_operands = 0 : i64, tpu.core_type = #tpu.core_type<tc>, window_params = [{transform_indices = @transform_0, window_bounds = array<i64: 1>}, {transform_indices = @transform_1, window_bounds = array<i64: 2, 32, 64>}, {pipeline_mode = #tpu.pipeline_mode<synchronous>, transform_indices = @transform_2, window_bounds = array<i64: 128, 32>}, {pipeline_mode = #tpu.pipeline_mode<synchronous>, transform_indices = @transform_3, window_bounds = array<i64: 1, 128>}, {transform_indices = @transform_4, window_bounds = array<i64: 2, 128>}]} {
    %c0 = arith.constant 0 : index
    %0 = memref.load %arg1[%c0] : memref<1xf32, #tpu.memory_space<smem>>
    %c0_0 = arith.constant 0 : index
    %c0_1 = arith.constant 0 : index
    %c0_2 = arith.constant 0 : index
    %1 = vector.load %arg2[%c0_0, %c0_1, %c0_2] : memref<2x32x64xf32, #tpu.memory_space<vmem>>, vector<2x32x64xf32>
    %cst = arith.constant 9.99999997E-7 : f32
    %2 = vector.broadcast %cst : f32 to vector<2x32x64xf32>
    %3 = arith.maximumf %1, %2 : vector<2x32x64xf32>
    %cst_3 = arith.constant 3.000000e+00 : f32
    %4 = arith.cmpf oeq, %0, %cst_3 : f32
    %5 = arith.extui %4 : i1 to i32
    %c0_i32 = arith.constant 0 : i32
    %6 = arith.cmpi ne, %5, %c0_i32 : i32
    %7 = scf.if %6 -> (vector<2x32x64xf32>) {
      %21 = arith.mulf %3, %3 : vector<2x32x64xf32>
      %22 = arith.mulf %21, %3 : vector<2x32x64xf32>
      scf.yield %22 : vector<2x32x64xf32>
    } else {
      %21 = math.log %3 : vector<2x32x64xf32>
      %22 = vector.broadcast %0 : f32 to vector<2x32x64xf32>
      %23 = arith.mulf %22, %21 : vector<2x32x64xf32>
      %24 = math.exp %23 : vector<2x32x64xf32>
      scf.yield %24 : vector<2x32x64xf32>
    }
    %cst_4 = arith.constant dense<0.000000e+00> : vector<2x32xf32>
    %8 = vector.multi_reduction <add>, %7, %cst_4 [2] : vector<2x32x64xf32> to vector<2x32xf32>
    %cst_5 = arith.constant 6.400000e+01 : f32
    %9 = vector.broadcast %cst_5 : f32 to vector<2x32xf32>
    %10 = arith.divf %8, %9 : vector<2x32xf32>
    %11 = math.log %10 : vector<2x32xf32>
    %12 = vector.broadcast %0 : f32 to vector<2x32xf32>
    %13 = arith.divf %11, %12 : vector<2x32xf32>
    %14 = math.exp %13 : vector<2x32xf32>
    %c0_6 = arith.constant 0 : index
    %c0_7 = arith.constant 0 : index
    %15 = vector.load %arg3[%c0_6, %c0_7] : memref<128x32xf32, #tpu.memory_space<vmem>>, vector<128x32xf32>
    %cst_8 = arith.constant dense<0.000000e+00> : vector<2x128xf32>
    %16 = tpu.matmul %14, %15, %cst_8 {dimension_numbers = #tpu.dot_dimension_numbers<[1], [1], [0], [0], [0, 0, 1, 0], [], []>} : vector<2x32xf32>, vector<128x32xf32>, vector<2x128xf32> -> vector<2x128xf32>
    %c0_9 = arith.constant 0 : index
    %c0_10 = arith.constant 0 : index
    %17 = vector.load %arg4[%c0_9, %c0_10] : memref<1x128xf32, #tpu.memory_space<vmem>>, vector<1x128xf32>
    %18 = vector.broadcast %17 : vector<1x128xf32> to vector<2x128xf32>
    %19 = arith.addf %16, %18 : vector<2x128xf32>
    %c0_11 = arith.constant 0 : index
    %c0_12 = arith.constant 0 : index
    %20 = vector.load %arg5[%c0_11, %c0_12] : memref<2x128xf32, #tpu.memory_space<vmem>>, vector<2x128xf32>
    tpu.vector_store %arg5[%c0_11, %c0_12], %19 {strides = array<i32>} : memref<2x128xf32, #tpu.memory_space<vmem>>, vector<2x128xf32>,
    return
  }
  func.func @transform_0(%arg0: i32) -> i32 {
    %c0_i32 = arith.constant 0 : i32
    %c0_i32_0 = arith.constant 0 : i32
    return %c0_i32 : i32
  }
  func.func @transform_1(%arg0: i32) -> (i32, i32, i32) {
    %c0_i32 = arith.constant 0 : i32
    %c0_i32_0 = arith.constant 0 : i32
    %c0_i32_1 = arith.constant 0 : i32
    return %arg0, %c0_i32, %c0_i32_0 : i32, i32, i32
  }
  func.func @transform_2(%arg0: i32) -> (i32, i32) {
    %c0_i32 = arith.constant 0 : i32
    %c0_i32_0 = arith.constant 0 : i32
    %c0_i32_1 = arith.constant 0 : i32
    return %c0_i32, %c0_i32_0 : i32, i32
  }
  func.func @transform_3(%arg0: i32) -> (i32, i32) {
    %c0_i32 = arith.constant 0 : i32
    %c0_i32_0 = arith.constant 0 : i32
    %c0_i32_1 = arith.constant 0 : i32
    return %c0_i32, %c0_i32_0 : i32, i32
  }
  func.func @transform_4(%arg0: i32) -> (i32, i32) {
    %c0_i32 = arith.constant 0 : i32
    %c0_i32_0 = arith.constant 0 : i32
    return %arg0, %c0_i32 : i32, i32
  }
}

</mosaic_0001>

<bundles_post_ra>
// kernel: tpu_custom_call.1
= control target key start
LH: loop header
LB: loop body
LE: loop exit
PB: predicated region body
PF: predicated region fallthrough
CT: control target
= control target key end

     0   :  { %v641_v5 = vmov 0.0   ;;  %vm271_vm0 = vcmask 261120   ;;  %s902_s0 = inlined_call_operand.<no memory space> [shape: f32[1], index: 0, kind: input, shape index: {}]   ;;  %s903_s1 = inlined_call_operand.vmem [shape: f32[2,32,64], index: 1, kind: input, shape index: {}]   ;;  %s904_s2 = inlined_call_operand.vmem [shape: f32[128,32], index: 2, kind: input, shape index: {}]   ;;  %s905_s3 = inlined_call_operand.vmem [shape: f32[1,128], index: 3, kind: input, shape index: {}]   ;;  %s906_s4 = inlined_call_operand.hbm [shape: f32[2,128], index: 4, kind: output, shape index: {}]  }
   0x1   :  { %v24_v0 = vld [vmem:[%s903_s1 + $0x20] sm:$0xff]  ;;  %v25_v2 = vld [vmem:[%s903_s1 + $0x28] sm:$0xff]  ;;  %p36_p0 = scmp.eq.f32.partialorder %s902_s0, 3.0  ;;  %442 = vmatprep.subr.mxu0 %v641_v5  ;;  %v26_v8 = vld [vmem:[%s903_s1 + $0x30] sm:$0xff] }
   0x2   :  { %v20_v1 = vld [vmem:[%s903_s1] sm:$0xff]  ;;  %v678_v3 = vmax.f32 %v24_v0, 1e-06  ;;  %v686_v6 = vmax.f32 %v25_v2, 1e-06  ;;  %v21_v7 = vld [vmem:[%s903_s1 + $0x8] sm:$0xff] }
   0x3   :  { %v683_v4 = vmax.f32 %v20_v1, 1e-06  ;;  %v207_v9 = vld [vmem:[%s904_s2 + $0x78] sm:$0xff]  ;;  %v699_v10 = vmax.f32 %v21_v7, 1e-06  ;;  %v22_v12 = vld [vmem:[%s903_s1 + $0x10] sm:$0xff] }
   0x4   :  { %553 = vlog2.f32 %v678_v3  ;;  %443 = vmatpush3.xpose.msk.msra.mxu0 %vm271_vm0, %v207_v9  ;;  %v702_v11 = vmax.f32 %v26_v8, 1e-06  ;;  %v206_v13 = vld [vmem:[%s904_s2 + $0x70] sm:$0xff] }
   0x5   :  { %555 = vlog2.f32 %v683_v4  ;;  %444 = vmatprep.subr.mxu0 %v641_v5 }
   0x6   :  { %10 = vsyncpa [#allocation4], 0  ;;  %557 = vlog2.f32 %v686_v6  ;;  %v27_v14 = vld [vmem:[%s903_s1 + $0x38] sm:$0xff]  ;;  %v719_v16 = vmax.f32 %v22_v12, 1e-06  ;;  %v205_v19 = vld [vmem:[%s904_s2 + $0x68] sm:$0xff]  ;;  %v739_v21 = vstv %s902_s0  ;;  %v44_v42 = vmul.f32 %v678_v3, %v678_v3 }
   0x7   :  { %v23_v15 = vld [vmem:[%s903_s1 + $0x18] sm:$0xff]  ;;  %559 = vlog2.f32 %v699_v10  ;;  %v723_v17 = vmax.f32 %v27_v14, 1e-06  ;;  %s477_s16 = scalar_select %p36_p0, 1, 0  ;;  %v40_v49 = vmul.f32 %v683_v4, %v683_v4  ;;  %v45_v54 = vmul.f32 %v686_v6, %v686_v6 }
   0x8   :  { %445 = vmatpush3.xpose.msk.msra.mxu0 %vm271_vm0, %v206_v13  ;;  %561 = vlog2.f32 %v702_v11  ;;  %v725_v18 = vmax.f32 %v23_v15, 1e-06  ;;  %s542_s19 = scalar_select %p36_p0, 0, 1  ;;  %v52_v56 = vmul.f32 %v44_v42, %v678_v3  ;;  %v41_v61 = vmul.f32 %v699_v10, %v699_v10 }
   0x9   :  { %446 = vmatprep.subr.mxu0 %v641_v5  ;;  %563 = vlog2.f32 %v719_v16  ;;  %v478_v48 = vstv %s477_s16  ;;  %v48_v60 = vmul.f32 %v40_v49, %v683_v4  ;;  %v46_v62 = vmul.f32 %v702_v11, %v702_v11  ;;  %v198_v49 = vld [vmem:[%s904_s2 + $0x30] sm:$0xff] }
   0xa   :  { %565 = vlog2.f32 %v723_v17  ;;  %vm764_vm1 = vcmp.ne.s32.totalorder %v478_v48, 0  ;;  %v511_v59 = vstv %s542_s19  ;;  %v53_v63 = vmul.f32 %v45_v54, %v686_v6  ;;  %v199_v48 = vld [vmem:[%s904_s2 + $0x38] sm:$0xff]  ;;  %v193_v54 = vld [vmem:[%s904_s2 + $0x8] sm:$0xff]  ;;  %s643_s19 = smov [#allocation3]  }
   0xb   :  { %567 = vlog2.f32 %v725_v18  ;;  %v42_v0 = vmul.f32 %v719_v16, %v719_v16  ;;  %v496_v1 = vsel %vm764_vm1, %v52_v56, 0  ;;  %vm778_vm2 = vcmp.ne.s32.totalorder %v511_v59, 0  ;;  %s399_s0 = sshll.u32 %s643_s19, 4  ;;  %s400_s0 = int_to_ptr.vmem [resolvable:$true] %s399_s0 }
   0xc   :  { %447 = vmatpush3.xpose.msk.msra.mxu0 %vm271_vm0, %v205_v19  ;;  %v47_v3 = vmul.f32 %v723_v17, %v723_v17  ;;  %vm116_vm3 = vcmask 523264   ;;  %v480_v4 = vsel %vm764_vm1, %v48_v60, 0  ;;  %v49_v7 = vmul.f32 %v41_v61, %v699_v10  ;;  %s619_s20 = scalar_lea.vmem %s400_s0, 32  ;;  %p624_p2 = scmp.lt.s32.totalorder %s400_s0, %s400_s0 }
   0xd   :  { %448 = vmatprep.subr.mxu0 %v641_v5  ;;  %v43_v6 = vmul.f32 %v725_v18, %v725_v18  ;;  %v54_v9 = vmul.f32 %v46_v62, %v702_v11  ;;  %v500_v14 = vsel %vm764_vm1, %v53_v63, 0  ;;  %v50_v15 = vmul.f32 %v42_v0, %v719_v16  ;;  %p620_p1 = scmp.ne.s32.totalorder %s400_s0, %s619_s20  ;;  %p625_p3 = scmp.lt.s32.totalorder %s619_s20, %s619_s20 }
   0xe   :  { %vm642_vm4 = vmmov 0   ;;  %vm234_vm5 = vcmask 130112   ;;  %vm241_vm6 = vcmask 195712   ;;  %vm248_vm7 = vcmask 261312  }
   0xf   :  { %474 = vmatprep.mubr.msk.f32.mxu0 %vm642_vm4, %v641_v5  ;;  %vm269_vm8 = vcmask 1041409   ;;  %p626_p4 = por %p625_p3, %p624_p2 }
  0x11   :  { %v554_v20 = vpop.eup %553  ;;  %p627_p5 = pnand %p626_p4, %p620_p1 }
  0x12   :  { %v556_v22 = vpop.eup %555  ;;  %v76_v23 = vmul.f32 0.6931472, %v554_v20  ;;  %v55_v20 = vmul.f32 %v47_v3, %v723_v17  ;;  %v488_v17 = vsel %vm764_vm1, %v50_v15, 0 }
  0x13   :  { %v68_v24 = vmul.f32 0.6931472, %v556_v22  ;;  %v558_v25 = vpop.eup %557 }
  0x14   :  { %v88_v26 = vmul.f32 %v739_v21, %v76_v23  ;;  %v78_v28 = vmul.f32 0.6931472, %v558_v25  ;;  %v560_v29 = vpop.eup %559  ;;  %v484_v23 = vsel %vm764_vm1, %v49_v7, 0  ;;  %v504_v25 = vsel %vm764_vm1, %v54_v9, 0 }
  0x15   :  { %v84_v27 = vmul.f32 %v739_v21, %v68_v24  ;;  %v562_v31 = vpop.eup %561  ;;  %v70_v34 = vmul.f32 0.6931472, %v560_v29  ;;  %v51_v24 = vmul.f32 %v43_v6, %v725_v18  ;;  %v508_v18 = vsel %vm764_vm1, %v55_v20, 0 }
  0x16   :  { %v100_v30 = vmul.f32 1.442695, %v88_v26  ;;  %v89_v33 = vmul.f32 %v739_v21, %v78_v28  ;;  %v564_v35 = vpop.eup %563  ;;  %v80_v36 = vmul.f32 0.6931472, %v562_v31 }
  0x17   :  { %v92_v32 = vmul.f32 1.442695, %v84_v27  ;;  %v566_v37 = vpop.eup %565  ;;  %v85_v39 = vmul.f32 %v739_v21, %v70_v34  ;;  %v72_v40 = vmul.f32 0.6931472, %v564_v35 }
  0x18   :  { %569 = vpow2.f32 %v100_v30  ;;  %v102_v38 = vmul.f32 1.442695, %v89_v33  ;;  %v568_v41 = vpop.eup %567  ;;  %v90_v43 = vmul.f32 %v739_v21, %v80_v36  ;;  %v82_v44 = vmul.f32 0.6931472, %v566_v37 }
  0x19   :  { %571 = vpow2.f32 %v92_v32  ;;  %v94_v45 = vmul.f32 1.442695, %v85_v39  ;;  %v86_v46 = vmul.f32 %v739_v21, %v72_v40  ;;  %v74_v47 = vmul.f32 0.6931472, %v568_v41 }
  0x1a   :  { %573 = vpow2.f32 %v102_v38  ;;  %v104_v50 = vmul.f32 1.442695, %v90_v43  ;;  %v91_v51 = vmul.f32 %v739_v21, %v82_v44  ;;  %v492_v33 = vsel %vm764_vm1, %v51_v24, 0  ;;  %v204_v43 = vld [vmem:[%s904_s2 + $0x60] sm:$0xff]  ;;  %v203_v44 = vld [vmem:[%s904_s2 + $0x58] sm:$0xff] }
  0x1b   :  { %575 = vpow2.f32 %v94_v45  ;;  %v96_v52 = vmul.f32 1.442695, %v86_v46  ;;  %v87_v53 = vmul.f32 %v739_v21, %v74_v47  ;;  %449 = vmatpush3.xpose.msk.msra.mxu0 %vm271_vm0, %v204_v43  ;;  %v202_v45 = vld [vmem:[%s904_s2 + $0x50] sm:$0xff]  ;;  %v201_v46 = vld [vmem:[%s904_s2 + $0x48] sm:$0xff]  ;;  %v200_v47 = vld [vmem:[%s904_s2 + $0x40] sm:$0xff] }
  0x1c   :  { %577 = vpow2.f32 %v104_v50  ;;  %v106_v55 = vmul.f32 1.442695, %v91_v51  ;;  %450 = vmatprep.subr.mxu0 %v641_v5  ;;  %v197_v50 = vld [vmem:[%s904_s2 + $0x28] sm:$0xff]  ;;  %v196_v51 = vld [vmem:[%s904_s2 + $0x20] sm:$0xff] }
  0x1d   :  { %579 = vpow2.f32 %v96_v52  ;;  %v98_v58 = vmul.f32 1.442695, %v87_v53  ;;  %v195_v52 = vld [vmem:[%s904_s2 + $0x18] sm:$0xff]  ;;  %v194_v53 = vld [vmem:[%s904_s2 + $0x10] sm:$0xff] }
  0x1e   :  { %581 = vpow2.f32 %v106_v55  ;;  %v192_v55 = vld [vmem:[%s904_s2] sm:$0xff] }
  0x1f   :  { %583 = vpow2.f32 %v98_v58  ;;  %451 = vmatpush3.xpose.msk.msra.mxu0 %vm271_vm0, %v203_v44 }
  0x20   :  { %452 = vmatprep.subr.mxu0 %v641_v5  ;;  %585 = vrcp.f32 %v739_v21 }
  0x23   :  { %453 = vmatpush3.xpose.msk.msra.mxu0 %vm271_vm0, %v202_v45 }
  0x24   :  { %454 = vmatprep.subr.mxu0 %v641_v5 }
  0x25   :  { %v570_v8 = vpop.eup %569 }
  0x26   :  { %v572_v12 = vpop.eup %571  ;;  %v529_v13 = vsel %vm778_vm2, %v570_v8, %v496_v1 }
  0x27   :  { %v129_v19 = vsel %vm116_vm3, %v529_v13, 0.0  ;;  %v513_v10 = vsel %vm778_vm2, %v572_v12, %v480_v4  ;;  %v574_v22 = vpop.eup %573  ;;  %455 = vmatpush3.xpose.msk.msra.mxu0 %vm271_vm0, %v201_v46 }
  0x28   :  { %130 = vadd.xlane.f32.xlu1 %v129_v19  ;;  %v117_v11 = vsel %vm116_vm3, %v513_v10, 0.0  ;;  %v533_v16 = vsel %vm778_vm2, %v574_v22, %v500_v14  ;;  %v576_v26 = vpop.eup %575  ;;  %456 = vmatprep.subr.mxu0 %v641_v5 }
  0x29   :  { %118 = vadd.xlane.f32.xlu0 %v117_v11  ;;  %v132_v27 = vsel %vm116_vm3, %v533_v16, 0.0  ;;  %v578_v28 = vpop.eup %577  ;;  %v517_v29 = vsel %vm778_vm2, %v576_v26, %v484_v23 }
  0x2a   :  { %v580_v30 = vpop.eup %579  ;;  %v120_v31 = vsel %vm116_vm3, %v517_v29, 0.0  ;;  %v537_v32 = vsel %vm778_vm2, %v578_v28, %v504_v25 }
  0x2b   :  { %v582_v34 = vpop.eup %581  ;;  %v135_v35 = vsel %vm116_vm3, %v537_v32, 0.0  ;;  %v521_v36 = vsel %vm778_vm2, %v580_v30, %v488_v17  ;;  %457 = vmatpush3.xpose.msk.msra.mxu0 %vm271_vm0, %v200_v47 }
  0x2c   :  { %133 = vadd.xlane.f32.xlu1 %v132_v27  ;;  %v584_v37 = vpop.eup %583  ;;  %v123_v38 = vsel %vm116_vm3, %v521_v36, 0.0  ;;  %v541_v39 = vsel %vm778_vm2, %v582_v34, %v508_v18  ;;  %458 = vmatprep.subr.mxu0 %v641_v5 }
  0x2d   :  { %121 = vadd.xlane.f32.xlu0 %v120_v31  ;;  %v525_v40 = vsel %vm778_vm2, %v584_v37, %v492_v33  ;;  %v138_v41 = vsel %vm116_vm3, %v541_v39, 0.0  ;;  %v586_v21 = vpop.eup %585 }
  0x2e   :  { %v126_v42 = vsel %vm116_vm3, %v525_v40, 0.0 }
  0x2f   :  { %459 = vmatpush3.xpose.msk.msra.mxu0 %vm271_vm0, %v199_v48 }
  0x30   :  { %136 = vadd.xlane.f32.xlu1 %v135_v35  ;;  %460 = vmatprep.subr.mxu0 %v641_v5 }
  0x31   :  { %124 = vadd.xlane.f32.xlu0 %v123_v38  ;;  %v223_v38 = vlaneseq }
  0x33   :  { %461 = vmatpush3.xpose.msk.msra.mxu0 %vm271_vm0, %v198_v49  ;;  %v226_v45 = vshrl.u32 %v223_v38, 7 }
  0x34   :  { %139 = vadd.xlane.f32.xlu1 %v138_v41  ;;  %462 = vmatprep.subr.mxu0 %v641_v5 }
  0x35   :  { %127 = vadd.xlane.f32.xlu0 %v126_v42  ;;  %v224_v42 = vand.u32 127, %v223_v38 }
  0x37   :  { %463 = vmatpush3.xpose.msk.msra.mxu0 %vm271_vm0, %v197_v50  ;;  %v229_v43 = vadd.s32 4294967288, %v224_v42  ;;  %v236_v44 = vadd.s32 4294967280, %v224_v42  ;;  %v243_v49 = vadd.s32 4294967272, %v224_v42 }
  0x38   :  { %464 = vmatprep.subr.mxu0 %v641_v5 }
  0x39   :  { %v232_v48 = vsub.s32 %v229_v43, %v226_v45 }
  0x3b   :  { %465 = vmatpush3.xpose.msk.msra.mxu0 %vm271_vm0, %v196_v51  ;;  %v239_v51 = vsub.s32 %v236_v44, %v226_v45 }
  0x3c   :  { %466 = vmatprep.subr.mxu0 %v641_v5 }
  0x3f   :  { %467 = vmatpush3.xpose.msk.msra.mxu0 %vm271_vm0, %v195_v52 }
  0x40   :  { %468 = vmatprep.subr.mxu0 %v641_v5 }
  0x43   :  { %469 = vmatpush3.xpose.msk.msra.mxu0 %vm271_vm0, %v194_v53  ;;  %v227_v53 = vsub.s32 %v224_v42, %v226_v45 }
  0x44   :  { %470 = vmatprep.subr.mxu0 %v641_v5 }
  0x47   :  { %471 = vmatpush3.xpose.msk.msra.mxu0 %vm271_vm0, %v193_v54 }
  0x48   :  { %472 = vmatprep.subr.mxu0 %v641_v5 }
  0x4b   :  { %473 = vmatpush3.xpose.msk.msra.mxu0 %vm271_vm0, %v192_v55 }
  0xb1   :  { %v131_v56 = vpop.xlane.xlu1 %130 }
  0xb2   :  { %v146_v57 = vmul.f32 0.015625, %v131_v56  ;;  %v119_v58 = vpop.xlane.xlu0 %118  ;;  %v246_v56 = vsub.s32 %v243_v49, %v226_v45 }
  0xb3   :  { %v142_v59 = vmul.f32 0.015625, %v119_v58 }
  0xb4   :  { %587 = vlog2.f32 %v146_v57 }
  0xb5   :  { %589 = vlog2.f32 %v142_v59  ;;  %v134_v60 = vpop.xlane.xlu1 %133 }
  0xb6   :  { %v147_v61 = vmul.f32 0.015625, %v134_v60  ;;  %v122_v62 = vpop.xlane.xlu0 %121 }
  0xb7   :  { %v143_v63 = vmul.f32 0.015625, %v122_v62 }
  0xb8   :  { %591 = vlog2.f32 %v147_v61 }
  0xb9   :  { %593 = vlog2.f32 %v143_v63  ;;  %v137_v5 = vpop.xlane.xlu1 %136 }
  0xba   :  { %v148_v0 = vmul.f32 0.015625, %v137_v5  ;;  %v125_v1 = vpop.xlane.xlu0 %124 }
  0xbb   :  { %v144_v2 = vmul.f32 0.015625, %v125_v1 }
  0xbc   :  { %595 = vlog2.f32 %v148_v0 }
  0xbd   :  { %597 = vlog2.f32 %v144_v2  ;;  %v140_v3 = vpop.xlane.xlu1 %139 }
  0xbe   :  { %v149_v4 = vmul.f32 0.015625, %v140_v3  ;;  %v128_v7 = vpop.xlane.xlu0 %127 }
  0xbf   :  { %v145_v6 = vmul.f32 0.015625, %v128_v7 }
  0xc0   :  { %599 = vlog2.f32 %v149_v4 }
  0xc1   :  { %v588_v8 = vpop.eup %587  ;;  %601 = vlog2.f32 %v145_v6 }
  0xc2   :  { %v590_v9 = vpop.eup %589  ;;  %v159_v12 = vmul.f32 0.6931472, %v588_v8 }
  0xc3   :  { %v151_v13 = vmul.f32 0.6931472, %v590_v9  ;;  %v407_v9 = vld [vmem:[%s905_s3] ss:$0 sm:$0xff] }
  0xc4   :  { %v172_v14 = vmul.f32 %v586_v21, %v159_v12 }
  0xc5   :  { %v592_v15 = vpop.eup %591  ;;  %v168_v19 = vmul.f32 %v586_v21, %v151_v13 }
  0xc6   :  { %v594_v10 = vpop.eup %593  ;;  %v161_v20 = vmul.f32 0.6931472, %v592_v15  ;;  %v184_v11 = vmul.f32 1.442695, %v172_v14 }
  0xc7   :  { %v153_v22 = vmul.f32 0.6931472, %v594_v10  ;;  %v176_v16 = vmul.f32 1.442695, %v168_v19 }
  0xc8   :  { %v173_v23 = vmul.f32 %v586_v21, %v161_v20  ;;  %603 = vpow2.f32 %v184_v11 }
  0xc9   :  { %v596_v24 = vpop.eup %595  ;;  %v169_v25 = vmul.f32 %v586_v21, %v153_v22  ;;  %605 = vpow2.f32 %v176_v16 }
  0xca   :  { %v598_v26 = vpop.eup %597  ;;  %v186_v27 = vmul.f32 1.442695, %v173_v23  ;;  %v163_v17 = vmul.f32 0.6931472, %v596_v24 }
  0xcb   :  { %v178_v28 = vmul.f32 1.442695, %v169_v25  ;;  %v155_v29 = vmul.f32 0.6931472, %v598_v26 }
  0xcc   :  { %v174_v18 = vmul.f32 %v586_v21, %v163_v17  ;;  %607 = vpow2.f32 %v186_v27 }
  0xcd   :  { %v600_v30 = vpop.eup %599  ;;  %v170_v31 = vmul.f32 %v586_v21, %v155_v29  ;;  %609 = vpow2.f32 %v178_v28 }
  0xce   :  { %v602_v32 = vpop.eup %601  ;;  %v188_v33 = vmul.f32 1.442695, %v174_v18  ;;  %v165_v34 = vmul.f32 0.6931472, %v600_v30 }
  0xcf   :  { %v180_v35 = vmul.f32 1.442695, %v170_v31  ;;  %v157_v36 = vmul.f32 0.6931472, %v602_v32 }
  0xd0   :  { %611 = vpow2.f32 %v188_v33  ;;  %v175_v37 = vmul.f32 %v586_v21, %v165_v34 }
  0xd1   :  { %613 = vpow2.f32 %v180_v35  ;;  %v171_v39 = vmul.f32 %v586_v21, %v157_v36 }
  0xd2   :  { %v190_v40 = vmul.f32 1.442695, %v175_v37 }
  0xd3   :  { %v182_v41 = vmul.f32 1.442695, %v171_v39 }
  0xd4   :  { %615 = vpow2.f32 %v190_v40 }
  0xd5   :  { %617 = vpow2.f32 %v182_v41  ;;  %v604_v46 = vpop.eup %603 }
  0xd6   :  { %v606_v47 = vpop.eup %605  ;;  %v253_v61 = vrot.slane %v604_v46, %v227_v53 }
  0xd7   :  { %v228_v63 = vrot.slane %v606_v47, %v227_v53 }
  0xd9   :  { %v608_v50 = vpop.eup %607 }
  0xda   :  { %v610_v52 = vpop.eup %609  ;;  %v257_v57 = vrot.slane %v608_v50, %v232_v48 }
  0xdb   :  { %v233_v58 = vrot.slane %v610_v52, %v232_v48 }
  0xdc   :  { %v258_v0 = vsel %vm234_vm5, %v257_v57, %v253_v61 }
  0xdd   :  { %v612_v54 = vpop.eup %611  ;;  %v235_v2 = vsel %vm234_vm5, %v233_v58, %v228_v63 }
  0xde   :  { %v614_v55 = vpop.eup %613  ;;  %v262_v59 = vrot.slane %v612_v54, %v239_v51 }
  0xdf   :  { %v240_v60 = vrot.slane %v614_v55, %v239_v51 }
  0xe0   :  { %v263_v4 = vsel %vm241_vm6, %v262_v59, %v258_v0 }
  0xe1   :  { %v616_v62 = vpop.eup %615  ;;  %v242_v7 = vsel %vm241_vm6, %v240_v60, %v235_v2 }
  0xe2   :  { %v618_v5 = vpop.eup %617  ;;  %v267_v1 = vrot.slane %v616_v62, %v246_v56 }
  0xe3   :  { %v247_v3 = vrot.slane %v618_v5, %v246_v56 }
  0xe4   :  { %v268_v6 = vsel %vm248_vm7, %v267_v1, %v263_v4 }
  0xe5   :  { %v249_v21 = vsel %vm248_vm7, %v247_v3, %v242_v7 }
  0xe6   :  { %v270_v8 = vsel %vm269_vm8, %v268_v6, %v249_v21 }
  0xe7   :  { %475 = vmatmul.mubr.msk.f32.vlgmr.msra.gmra.mxu0 %vm271_vm0, %v270_v8 }
 0x1a7   :  { %v388_v12 = vpop.f32.mrf.mxu0 }
 0x1a8   :  { %v389_v13 = vadd.f32 %v407_v9, %v388_v12 }
 0x1a9   :  { %v476_v14 = vpop.f32.mrf.mxu0 }
 0x1aa   :  { %392 = vst [vmem:[#allocation3] sm:$0x3] %v389_v13 }
 0x1ab   :  { %630 = shalt.err (!%p627_p5)
}
 0x1ac   :  { %402 = dma.vmem_to_hbm [thread:$0]  %s400_s0, 32, %s906_s4, [#allocation4]  }
 0x1ad   :  { %639 = dma.done.wait [#allocation4], 32  }
 0x1ae   :  { %640 = vsyncadd [#allocation4], 4294967264 }
 0x1af   :  { %406 = vsyncpa [#allocation4], 1 }

</bundles_post_ra>
